<compile_context>
chip_gen: v7x
topology: tpu7x:2x2x1
jax: 0.10.0
libtpu: 0.0.40
codegen_flags: <defaults>
</compile_context>

<pallas_src>
import functools

import jax
import jax.numpy as jnp
from jax.experimental import pallas as pl
from jax.experimental.pallas import tpu as pltpu

LANE = 128


def _round_up(x, m):
    return ((x + m - 1) // m) * m


@functools.lru_cache(maxsize=None)
def _vmem_budgets():
    """(tile-planning budget, scoped vmem limit) per TPU generation.

    v7x has 64 MiB of VMEM per TensorCore; v4/v5e/v6e have 128 MiB.  Tiling is
    planned against ~half the physical capacity and the Mosaic scoped limit is
    raised to ~3/4 of it (instead of a single hard-coded constant).
    """
    try:
        kind = jax.devices()[0].device_kind.lower()
    except Exception:  # pragma: no cover - defensive
        kind = ""
    if "v7" in kind:
        phys = 64 * 1024 * 1024
    elif any(g in kind for g in ("v4", "v5", "v6")):
        phys = 128 * 1024 * 1024
    else:
        phys = 64 * 1024 * 1024  # unknown generation: assume the smaller budget
    return phys // 2, (phys * 3) // 4


# ---------------------------------------------------------------------------
# Kernels
# ---------------------------------------------------------------------------
def _proj_kernel(x_ref, w_ref, dinv_ref, o_ref):
    # H' = (X @ W) * d^{-1/2}   (MXU matmul, f32 accumulation, f32 row scaling)
    hw = jnp.dot(x_ref[...], w_ref[...], preferred_element_type=jnp.float32)
    o_ref[...] = (hw * dinv_ref[...]).astype(o_ref.dtype)


def _agg_fullk_kernel(a_ref, h_ref, dinv_ref, b_ref, o_ref):
    # Y = relu(d^{-1/2} * (S @ H') + b); whole K in one dot, H' resident in VMEM,
    # no accumulator scratch, no pl.when.
    a = a_ref[...].astype(jnp.float32).astype(h_ref.dtype)  # int8 -> bf16 (exact)
    acc = jnp.dot(a, h_ref[...], preferred_element_type=jnp.float32)
    o_ref[...] = jnp.maximum(acc * dinv_ref[...] + b_ref[...], 0.0).astype(o_ref.dtype)


def _agg_ktiled_kernel(a_ref, h_ref, dinv_ref, b_ref, o_ref, acc_ref, *, tk,
                       h_resident):
    # Fallback for very large N: grid=(rows, K) with an f32 VMEM accumulator.
    k = pl.program_id(1)

    @pl.when(k == 0)
    def _zero():
        acc_ref[...] = jnp.zeros_like(acc_ref)

    a = a_ref[...].astype(jnp.float32).astype(h_ref.dtype)  # int8 -> bf16 (exact)
    if h_resident:
        h_blk = h_ref[pl.ds(pl.multiple_of(k * tk, tk), tk), :]
    else:
        h_blk = h_ref[...]
    acc_ref[...] += jnp.dot(a, h_blk, preferred_element_type=jnp.float32)

    @pl.when(k == pl.num_programs(1) - 1)
    def _finalize():
        o_ref[...] = jnp.maximum(
            acc_ref[...] * dinv_ref[...] + b_ref[...], 0.0
        ).astype(o_ref.dtype)


def _make_fused_encoder_kernel(num_layers, compute_dtype):
    """All layers in one kernel: everything resident in VMEM."""

    def kernel(s_ref, dinv_ref, x_ref, *refs):
        w_refs = refs[0:2 * num_layers:2]
        b_refs = refs[1:2 * num_layers:2]
        o_ref = refs[2 * num_layers]
        s = s_ref[...].astype(jnp.float32).astype(compute_dtype)  # exact counts
        dinv = dinv_ref[...]                                      # (n_pad, 1) f32
        h = x_ref[...]
        for layer in range(num_layers):
            hw = jnp.dot(h, w_refs[layer][...], preferred_element_type=jnp.float32)
            hp = (hw * dinv).astype(compute_dtype)                # pre-scale by d^{-1/2}
            agg = jnp.dot(s, hp, preferred_element_type=jnp.float32)
            h = jnp.maximum(agg * dinv + b_refs[layer][...], 0.0).astype(compute_dtype)
        o_ref[...] = h

    return kernel


# ---------------------------------------------------------------------------
# Tile planners (account for the in-kernel int8 -> f32 -> bf16 conversion temps)
# ---------------------------------------------------------------------------
def _plan_projection(n_pad, f_in_pad, f_out_pad, budget, itemsize):
    for tm in (2048, 1024, 512, 256):
        if n_pad % tm:
            continue
        need = (2 * tm * f_in_pad * itemsize            # X tiles (double buffered)
                + 2 * f_in_pad * f_out_pad * itemsize   # W (resident)
                + 2 * tm * f_out_pad * itemsize         # output tiles
                + 2 * tm * 4)                           # d^{-1/2} tiles
        if need <= budget:
            return tm
    return 256


def _plan_aggregation(n_pad, f_out_pad, budget, itemsize, allow_full_k=True):
    """Pick (tm, tk, h_resident) for Y = relu(d * (S @ H') + b)."""

    def fits(tm, tk, h_resident):
        need = (2 * tm * tk                             # int8 S tiles (double buffered)
                + tm * tk * (4 + itemsize)              # f32 + bf16 conversion temps
                + (2 * n_pad * f_out_pad * itemsize if h_resident
                   else 2 * tk * f_out_pad * itemsize)  # H'
                + 2 * tm * f_out_pad * itemsize         # output tiles
                + tm * f_out_pad * 4                    # f32 accumulator (K-tiled)
                + 2 * (tm * 4 + f_out_pad * 4))         # d^{-1/2} + bias
        return need <= budget

    if allow_full_k:
        # Collapse K entirely.  Keep >= 2 row tiles so the "parallel" axis can
        # shard across v7x's two TensorCores.
        for tm in (1024, 512, 256):
            if n_pad % tm == 0 and n_pad // tm >= 2 and fits(tm, n_pad, True):
                return tm, n_pad, True
    # K-tiled fallback with large tiles (very large N); keep H' resident if it fits.
    for h_resident in (True, False):
        for tm in (512, 256):
            if n_pad % tm:
                continue
            for tk in (4096, 2048, 1024, 512):
                if n_pad % tk == 0 and fits(tm, tk, h_resident):
                    return tm, tk, h_resident
    return 256, 512, False


def _fused_footprint_bytes(n_pad, f_in_pad, params, itemsize):
    f_pads = [_round_up(w.shape[1], LANE) for w, _ in params]
    f_max = max(f_pads + [f_in_pad])
    need = n_pad * n_pad * (1 + 4 + itemsize)        # S: int8 in, f32 temp, bf16 copy
    need += 2 * n_pad * f_in_pad * itemsize          # X
    need += n_pad * f_max * (4 + 4 + 2 * itemsize)   # per-layer temporaries
    fin = f_in_pad
    for (_, _), fo in zip(params, f_pads):
        need += 2 * fin * fo * itemsize + 2 * fo * 4
        fin = fo
    need += 2 * n_pad * f_pads[-1] * itemsize        # output
    return need


# ---------------------------------------------------------------------------
# Fused small-graph path: all layers in ONE pallas_call
# ---------------------------------------------------------------------------
def _encoder_fused_small(params, s_p, dinv_p, x_p, *, compute_dtype, vmem_limit):
    n_pad, f_in_pad = x_p.shape
    num_layers = len(params)

    operands = [s_p, dinv_p, x_p]
    fin_pad = f_in_pad
    flops = 0
    for w, b in params:
        f_in, f_out = w.shape
        fo_pad = _round_up(f_out, LANE)
        w_p = jnp.zeros((fin_pad, fo_pad), compute_dtype)
        w_p = w_p.at[:f_in, :f_out].set(w.astype(compute_dtype))
        b_p = jnp.zeros((1, fo_pad), jnp.float32)
        b_p = b_p.at[0, :f_out].set(b.astype(jnp.float32))
        operands += [w_p, b_p]
        flops += 2 * n_pad * fin_pad * fo_pad + 2 * n_pad * n_pad * fo_pad
        fin_pad = fo_pad
    f_out_final_pad = fin_pad

    def full_spec(shape):
        return pl.BlockSpec(shape, lambda i: (0,) * len(shape))

    in_specs = [full_spec(op.shape) for op in operands]
    bytes_accessed = sum(int(op.size) * op.dtype.itemsize for op in operands)
    bytes_accessed += n_pad * f_out_final_pad * jnp.dtype(compute_dtype).itemsize

    # TODO(synk): split rows across two tiles so v7x's second TensorCore is used
    #             on this single-block path as well.
    return pl.pallas_call(
        _make_fused_encoder_kernel(num_layers, compute_dtype),
        out_shape=jax.ShapeDtypeStruct((n_pad, f_out_final_pad), compute_dtype),
        grid=(1,),
        in_specs=in_specs,
        out_specs=full_spec((n_pad, f_out_final_pad)),
        compiler_params=pltpu.CompilerParams(
            dimension_semantics=("arbitrary",),
            vmem_limit_bytes=vmem_limit,
        ),
        cost_estimate=pl.CostEstimate(
            flops=flops, transcendentals=0, bytes_accessed=bytes_accessed),
    )(*operands)


# ---------------------------------------------------------------------------
# One GCN layer on pre-padded operands (large-graph path):
#   Y = relu(d^{-1/2} * (S @ ((X @ W) * d^{-1/2})) + b)
# ---------------------------------------------------------------------------
def gcn_layer_padded(s_p, h_p, dinv_p, w, b, *, compute_dtype, plan_budget,
                     vmem_limit, force_k_tiling=False):
    n_pad = s_p.shape[0]
    f_in, f_out = w.shape
    f_in_pad = h_p.shape[1]
    f_out_pad = _round_up(f_out, LANE)
    itemsize = jnp.dtype(compute_dtype).itemsize

    # zero-pad parameters: padded W rows/cols 0, padded bias 0 -> exact math
    w_p = jnp.zeros((f_in_pad, f_out_pad), compute_dtype)
    w_p = w_p.at[:f_in, :f_out].set(w.astype(compute_dtype))
    b_p = jnp.zeros((1, f_out_pad), jnp.float32)
    b_p = b_p.at[0, :f_out].set(b.astype(jnp.float32))

    # ---- stage 1: H' = (X @ W) * d^{-1/2}, big row tiles (hoisted out of S@H) ----
    tm_p = _plan_projection(n_pad, f_in_pad, f_out_pad, plan_budget, itemsize)
    h = pl.pallas_call(
        _proj_kernel,
        out_shape=jax.ShapeDtypeStruct((n_pad, f_out_pad), compute_dtype),
        grid=(n_pad // tm_p,),
        in_specs=[
            pl.BlockSpec((tm_p, f_in_pad), lambda i: (i, 0)),          # X row tile
            pl.BlockSpec((f_in_pad, f_out_pad), lambda i: (0, 0)),     # W (resident)
            pl.BlockSpec((tm_p, 1), lambda i: (i, 0)),                 # d^{-1/2}
        ],
        out_specs=pl.BlockSpec((tm_p, f_out_pad), lambda i: (i, 0)),
        compiler_params=pltpu.CompilerParams(
            dimension_semantics=("parallel",), vmem_limit_bytes=vmem_limit),
        cost_estimate=pl.CostEstimate(
            flops=2 * n_pad * f_in_pad * f_out_pad, transcendentals=0,
            bytes_accessed=(n_pad * f_in_pad + f_in_pad * f_out_pad
                            + n_pad * f_out_pad) * itemsize + n_pad * 4),
    )(h_p, w_p, dinv_p)

    # ---- stage 2: Y = relu(d^{-1/2} * (S @ H') + b) ----
    tm, tk, h_resident = _plan_aggregation(
        n_pad, f_out_pad, plan_budget, itemsize,
        allow_full_k=not force_k_tiling)
    n_row_tiles = n_pad // tm

    agg_cost = pl.CostEstimate(
        flops=2 * n_pad * n_pad * f_out_pad,
        transcendentals=0,
        bytes_accessed=(n_pad * n_pad                                   # S (int8)
                        + n_pad * f_out_pad * itemsize
                        * (1 if h_resident else n_row_tiles)            # H'
                        + n_pad * f_out_pad * itemsize                  # Y
                        + n_pad * 4 + f_out_pad * 4))

    if tk == n_pad and not force_k_tiling:
        # Collapsed-K: one S row-slab per grid step, H' resident, no accumulator.
        out = pl.pallas_call(
            _agg_fullk_kernel,
            out_shape=jax.ShapeDtypeStruct((n_pad, f_out_pad), compute_dtype),
            grid=(n_row_tiles,),
            in_specs=[
                pl.BlockSpec((tm, n_pad), lambda i: (i, 0)),            # S row slab
                pl.BlockSpec((n_pad, f_out_pad), lambda i: (0, 0)),     # H' (resident)
                pl.BlockSpec((tm, 1), lambda i: (i, 0)),                # d^{-1/2}
                pl.BlockSpec((1, f_out_pad), lambda i: (0, 0)),         # bias
            ],
            out_specs=pl.BlockSpec((tm, f_out_pad), lambda i: (i, 0)),
            compiler_params=pltpu.CompilerParams(
                dimension_semantics=("parallel",), vmem_limit_bytes=vmem_limit),
            cost_estimate=agg_cost,
        )(s_p, h, dinv_p, b_p)
    else:
        if h_resident:
            h_spec = pl.BlockSpec((n_pad, f_out_pad), lambda i, k: (0, 0))
        else:
            h_spec = pl.BlockSpec((tk, f_out_pad), lambda i, k: (k, 0))
        out = pl.pallas_call(
            functools.partial(_agg_ktiled_kernel, tk=tk, h_resident=h_resident),
            out_shape=jax.ShapeDtypeStruct((n_pad, f_out_pad), compute_dtype),
            grid=(n_row_tiles, n_pad // tk),                            # K axis last
            in_specs=[
                pl.BlockSpec((tm, tk), lambda i, k: (i, k)),            # S tile
                h_spec,                                                 # H'
                pl.BlockSpec((tm, 1), lambda i, k: (i, 0)),             # d^{-1/2}
                pl.BlockSpec((1, f_out_pad), lambda i, k: (0, 0)),      # bias
            ],
            out_specs=pl.BlockSpec((tm, f_out_pad), lambda i, k: (i, 0)),
            scratch_shapes=[pltpu.VMEM((tm, f_out_pad), jnp.float32)],
            compiler_params=pltpu.CompilerParams(
                dimension_semantics=("parallel", "arbitrary"),
                vmem_limit_bytes=vmem_limit),
            cost_estimate=agg_cost,
        )(s_p, h, dinv_p, b_p)
    return out


# ---------------------------------------------------------------------------
# Glue: S = (A + I) counts and d^{-1/2}, matching PyG gcn_norm semantics
# (duplicate off-diagonal edges are summed; existing self loops are replaced by
#  exactly one self loop of weight 1, as add_remaining_self_loops does).
# ---------------------------------------------------------------------------
def build_graph_operator(edge_index, num_nodes):
    src, dst = edge_index[0], edge_index[1]
    off_diag = (src != dst).astype(jnp.float32)
    s = jnp.zeros((num_nodes, num_nodes), jnp.float32)
    s = s.at[dst, src].add(off_diag)
    s = s + jnp.eye(num_nodes, dtype=jnp.float32)
    deg = s.sum(axis=1)
    d_inv_sqrt = jnp.where(deg > 0, jax.lax.rsqrt(deg), 0.0)
    return s, d_inv_sqrt


def init_encoder_params(key, in_channels, out_channels, num_layers):
    """Glorot-uniform weights / zero biases; mirrors the torch Encoder shapes."""
    assert num_layers >= 2
    dims = [in_channels] + [2 * out_channels] * (num_layers - 1) + [out_channels]
    params = []
    for i in range(num_layers):
        key, wk = jax.random.split(key)
        f_in, f_out = dims[i], dims[i + 1]
        limit = jnp.sqrt(6.0 / (f_in + f_out))
        w = jax.random.uniform(wk, (f_in, f_out), jnp.float32, -limit, limit)
        params.append((w, jnp.zeros((f_out,), jnp.float32)))
    return params


# ---------------------------------------------------------------------------
# Encoder forward (== GCA.forward)
# ---------------------------------------------------------------------------
def encoder_forward(params, x, s, dinv_sqrt, *, compute_dtype=jnp.bfloat16,
                    force_k_tiling=False):
    n, f_in = x.shape
    f_out_final = params[-1][0].shape[1]
    itemsize = jnp.dtype(compute_dtype).itemsize
    plan_budget, vmem_limit = _vmem_budgets()

    f_in_pad = _round_up(f_in, LANE)
    use_fused = (
        not force_k_tiling
        and n <= 1024
        and _fused_footprint_bytes(_round_up(n, LANE), f_in_pad, params, itemsize)
        <= plan_budget
    )
    n_pad = _round_up(n, LANE) if use_fused else _round_up(n, 512)

    # Exact int8 (A + I) counts; D^{-1/2} applied in f32 inside the kernels.
    # (Counts > 127 would saturate; realistic graphs have 0/1 entries + self loop.)
    s_p = jnp.zeros((n_pad, n_pad), jnp.int8)
    s_p = s_p.at[:n, :n].set(jnp.clip(s, 0.0, 127.0).astype(jnp.int8))
    dinv_p = jnp.zeros((n_pad, 1), jnp.float32)
    dinv_p = dinv_p.at[:n, 0].set(dinv_sqrt.astype(jnp.float32))
    x_p = jnp.zeros((n_pad, f_in_pad), compute_dtype)
    x_p = x_p.at[:n, :f_in].set(x.astype(compute_dtype))

    if use_fused:
        out = _encoder_fused_small(params, s_p, dinv_p, x_p,
                                   compute_dtype=compute_dtype,
                                   vmem_limit=vmem_limit)
    else:
        h = x_p
        for w, b in params:
            h = gcn_layer_padded(s_p, h, dinv_p, w, b,
                                 compute_dtype=compute_dtype,
                                 plan_budget=plan_budget,
                                 vmem_limit=vmem_limit,
                                 force_k_tiling=force_k_tiling)
        out = h
    return out[:n, :f_out_final].astype(jnp.float32)


def gca_forward(params, x, edge_index, **kwargs):
    """GCA.forward(x, edge_index) == Encoder(x, edge_index)."""
    s, dinv_sqrt = build_graph_operator(edge_index, x.shape[0])
    return encoder_forward(params, x, s, dinv_sqrt, **kwargs)


# ---------------------------------------------------------------------------
# Pure-JAX references for correctness checking
# ---------------------------------------------------------------------------
def encoder_forward_ref(params, x, s, dinv_sqrt, compute_dtype=jnp.bfloat16):
    """Mirrors the kernels' dtype policy (bf16 operands, f32 accum, f32 D^{-1/2})."""
    sd = s.astype(compute_dtype)                      # integer counts: exact in bf16
    dinv = dinv_sqrt.astype(jnp.float32)[:, None]
    h = x.astype(compute_dtype)
    for w, b in params:
        hw = jnp.dot(h, w.astype(compute_dtype), preferred_element_type=jnp.float32)
        hp = (hw * dinv).astype(compute_dtype)
        agg = jnp.dot(sd, hp, preferred_element_type=jnp.float32)
        h = jnp.maximum(agg * dinv + b[None, :], 0.0).astype(compute_dtype)
    return h.astype(jnp.float32)


def encoder_forward_ref_f32(params, x, s, dinv_sqrt):
    a_hat = dinv_sqrt[:, None] * s * dinv_sqrt[None, :]
    h = x
    for w, b in params:
        h = jnp.maximum(a_hat @ (h @ w) + b[None, :], 0.0)
    return h


if __name__ == "__main__":
    key = jax.random.PRNGKey(0)

    # ---- small graph (demo sizes): single fully fused Pallas kernel ----
    num_nodes, num_feature, num_hidden, num_layers = 16, 8, 8, 3
    key, kx, ke, kp = jax.random.split(key, 4)
    x = jax.random.normal(kx, (num_nodes, num_feature), jnp.float32)
    edge_index = jax.random.randint(ke, (2, 40), 0, num_nodes)
    params = init_encoder_params(kp, num_feature, num_hidden, num_layers)

    out = jax.block_until_ready(jax.jit(gca_forward)(params, x, edge_index))
    assert out.shape == (num_nodes, num_hidden)

    s, dinv_sqrt = build_graph_operator(edge_index, num_nodes)
    ref = encoder_forward_ref(params, x, s, dinv_sqrt)
    assert jnp.allclose(out, ref, atol=5e-3, rtol=5e-3), float(
        jnp.max(jnp.abs(out - ref)))
    ref32 = encoder_forward_ref_f32(params, x, s, dinv_sqrt)
    assert jnp.allclose(out, ref32, atol=1e-1, rtol=1e-1), float(
        jnp.max(jnp.abs(out - ref32)))

    # ---- medium graph: exercises the tiled per-layer path
    #      (collapsed-K aggregation and the K-tiled fallback) ----
    n2, f2, e2 = 1500, 48, 6000
    key, kx2, ke2, kp2 = jax.random.split(key, 4)
    x2 = jax.random.normal(kx2, (n2, f2), jnp.float32)
    edge_index2 = jax.random.randint(ke2, (2, e2), 0, n2)
    s2, dinv2 = build_graph_operator(edge_index2, n2)
    params2 = init_encoder_params(kp2, f2, num_hidden, num_layers)
    ref2 = encoder_forward_ref(params2, x2, s2, dinv2)

    out2 = jax.block_until_ready(jax.jit(encoder_forward)(params2, x2, s2, dinv2))
    assert out2.shape == (n2, num_hidden)
    assert jnp.allclose(out2, ref2, atol=2e-2, rtol=2e-2), float(
        jnp.max(jnp.abs(out2 - ref2)))

    out3 = jax.block_until_ready(
        jax.jit(functools.partial(encoder_forward, force_k_tiling=True))(
            params2, x2, s2, dinv2))
    assert jnp.allclose(out3, ref2, atol=2e-2, rtol=2e-2), float(
        jnp.max(jnp.abs(out3 - ref2)))

    print("KERNEL_OK")
</pallas_src>

<mosaic_0001>
module attributes {stable_mosaic.version = 11 : i64} {
  func.func @kernel(%arg0: i32, %arg1: memref<128x128xi8, #tpu.memory_space<vmem>>, %arg2: memref<128x1xf32, #tpu.memory_space<vmem>>, %arg3: memref<128x128xbf16, #tpu.memory_space<vmem>>, %arg4: memref<128x128xbf16, #tpu.memory_space<vmem>>, %arg5: memref<1x128xf32, #tpu.memory_space<vmem>>, %arg6: memref<128x128xbf16, #tpu.memory_space<vmem>>, %arg7: memref<1x128xf32, #tpu.memory_space<vmem>>, %arg8: memref<128x128xbf16, #tpu.memory_space<vmem>>, %arg9: memref<1x128xf32, #tpu.memory_space<vmem>>, %arg10: memref<128x128xbf16, #tpu.memory_space<vmem>>) attributes {dimension_semantics = [#tpu.dimension_semantics<arbitrary>], iteration_bounds = array<i64: 1>, scalar_prefetch = 0 : i64, scratch_operands = 0 : i64, tpu.core_type = #tpu.core_type<tc>, window_params = [{pipeline_mode = #tpu.pipeline_mode<synchronous>, transform_indices = @transform_0, window_bounds = array<i64: 128, 128>}, {pipeline_mode = #tpu.pipeline_mode<synchronous>, transform_indices = @transform_1, window_bounds = array<i64: 128, 1>}, {pipeline_mode = #tpu.pipeline_mode<synchronous>, transform_indices = @transform_2, window_bounds = array<i64: 128, 128>}, {pipeline_mode = #tpu.pipeline_mode<synchronous>, transform_indices = @transform_3, window_bounds = array<i64: 128, 128>}, {pipeline_mode = #tpu.pipeline_mode<synchronous>, transform_indices = @transform_4, window_bounds = array<i64: 1, 128>}, {pipeline_mode = #tpu.pipeline_mode<synchronous>, transform_indices = @transform_5, window_bounds = array<i64: 128, 128>}, {pipeline_mode = #tpu.pipeline_mode<synchronous>, transform_indices = @transform_6, window_bounds = array<i64: 1, 128>}, {pipeline_mode = #tpu.pipeline_mode<synchronous>, transform_indices = @transform_7, window_bounds = array<i64: 128, 128>}, {pipeline_mode = #tpu.pipeline_mode<synchronous>, transform_indices = @transform_8, window_bounds = array<i64: 1, 128>}, {pipeline_mode = #tpu.pipeline_mode<synchronous>, transform_indices = @transform_9, window_bounds = array<i64: 128, 128>}]} {
    %c0 = arith.constant 0 : index
    %c0_0 = arith.constant 0 : index
    %0 = vector.load %arg1[%c0, %c0_0] : memref<128x128xi8, #tpu.memory_space<vmem>>, vector<128x128xi8>
    %1 = arith.sitofp %0 : vector<128x128xi8> to vector<128x128xf32>
    %2 = arith.truncf %1 : vector<128x128xf32> to vector<128x128xbf16>
    %c0_1 = arith.constant 0 : index
    %c0_2 = arith.constant 0 : index
    %3 = vector.load %arg2[%c0_1, %c0_2] : memref<128x1xf32, #tpu.memory_space<vmem>>, vector<128x1xf32>
    %c0_3 = arith.constant 0 : index
    %c0_4 = arith.constant 0 : index
    %4 = vector.load %arg3[%c0_3, %c0_4] : memref<128x128xbf16, #tpu.memory_space<vmem>>, vector<128x128xbf16>
    %c0_5 = arith.constant 0 : index
    %c0_6 = arith.constant 0 : index
    %5 = vector.load %arg4[%c0_5, %c0_6] : memref<128x128xbf16, #tpu.memory_space<vmem>>, vector<128x128xbf16>
    %cst = arith.constant dense<0.000000e+00> : vector<128x128xf32>
    %6 = tpu.matmul %4, %5, %cst {dimension_numbers = #tpu.dot_dimension_numbers<[1], [0], [0], [1], [0, 0, 1, 1], [], []>} : vector<128x128xbf16>, vector<128x128xbf16>, vector<128x128xf32> -> vector<128x128xf32>
    %7 = vector.broadcast %3 : vector<128x1xf32> to vector<128x128xf32>
    %8 = arith.mulf %6, %7 : vector<128x128xf32>
    %9 = arith.truncf %8 : vector<128x128xf32> to vector<128x128xbf16>
    %cst_7 = arith.constant dense<0.000000e+00> : vector<128x128xf32>
    %10 = tpu.matmul %2, %9, %cst_7 {dimension_numbers = #tpu.dot_dimension_numbers<[1], [0], [0], [1], [0, 0, 1, 1], [], []>} : vector<128x128xbf16>, vector<128x128xbf16>, vector<128x128xf32> -> vector<128x128xf32>
    %11 = vector.broadcast %3 : vector<128x1xf32> to vector<128x128xf32>
    %12 = arith.mulf %10, %11 : vector<128x128xf32>
    %c0_8 = arith.constant 0 : index
    %c0_9 = arith.constant 0 : index
    %13 = vector.load %arg5[%c0_8, %c0_9] : memref<1x128xf32, #tpu.memory_space<vmem>>, vector<1x128xf32>
    %14 = vector.broadcast %13 : vector<1x128xf32> to vector<128x128xf32>
    %15 = arith.addf %12, %14 : vector<128x128xf32>
    %cst_10 = arith.constant 0.000000e+00 : f32
    %16 = vector.broadcast %cst_10 : f32 to vector<128x128xf32>
    %17 = arith.maximumf %15, %16 : vector<128x128xf32>
    %18 = arith.truncf %17 : vector<128x128xf32> to vector<128x128xbf16>
    %c0_11 = arith.constant 0 : index
    %c0_12 = arith.constant 0 : index
    %19 = vector.load %arg6[%c0_11, %c0_12] : memref<128x128xbf16, #tpu.memory_space<vmem>>, vector<128x128xbf16>
    %cst_13 = arith.constant dense<0.000000e+00> : vector<128x128xf32>
    %20 = tpu.matmul %18, %19, %cst_13 {dimension_numbers = #tpu.dot_dimension_numbers<[1], [0], [0], [1], [0, 0, 1, 1], [], []>} : vector<128x128xbf16>, vector<128x128xbf16>, vector<128x128xf32> -> vector<128x128xf32>
    %21 = vector.broadcast %3 : vector<128x1xf32> to vector<128x128xf32>
    %22 = arith.mulf %20, %21 : vector<128x128xf32>
    %23 = arith.truncf %22 : vector<128x128xf32> to vector<128x128xbf16>
    %cst_14 = arith.constant dense<0.000000e+00> : vector<128x128xf32>
    %24 = tpu.matmul %2, %23, %cst_14 {dimension_numbers = #tpu.dot_dimension_numbers<[1], [0], [0], [1], [0, 0, 1, 1], [], []>} : vector<128x128xbf16>, vector<128x128xbf16>, vector<128x128xf32> -> vector<128x128xf32>
    %25 = vector.broadcast %3 : vector<128x1xf32> to vector<128x128xf32>
    %26 = arith.mulf %24, %25 : vector<128x128xf32>
    %c0_15 = arith.constant 0 : index
    %c0_16 = arith.constant 0 : index
    %27 = vector.load %arg7[%c0_15, %c0_16] : memref<1x128xf32, #tpu.memory_space<vmem>>, vector<1x128xf32>
    %28 = vector.broadcast %27 : vector<1x128xf32> to vector<128x128xf32>
    %29 = arith.addf %26, %28 : vector<128x128xf32>
    %cst_17 = arith.constant 0.000000e+00 : f32
    %30 = vector.broadcast %cst_17 : f32 to vector<128x128xf32>
    %31 = arith.maximumf %29, %30 : vector<128x128xf32>
    %32 = arith.truncf %31 : vector<128x128xf32> to vector<128x128xbf16>
    %c0_18 = arith.constant 0 : index
    %c0_19 = arith.constant 0 : index
    %33 = vector.load %arg8[%c0_18, %c0_19] : memref<128x128xbf16, #tpu.memory_space<vmem>>, vector<128x128xbf16>
    %cst_20 = arith.constant dense<0.000000e+00> : vector<128x128xf32>
    %34 = tpu.matmul %32, %33, %cst_20 {dimension_numbers = #tpu.dot_dimension_numbers<[1], [0], [0], [1], [0, 0, 1, 1], [], []>} : vector<128x128xbf16>, vector<128x128xbf16>, vector<128x128xf32> -> vector<128x128xf32>
    %35 = vector.broadcast %3 : vector<128x1xf32> to vector<128x128xf32>
    %36 = arith.mulf %34, %35 : vector<128x128xf32>
    %37 = arith.truncf %36 : vector<128x128xf32> to vector<128x128xbf16>
    %cst_21 = arith.constant dense<0.000000e+00> : vector<128x128xf32>
    %38 = tpu.matmul %2, %37, %cst_21 {dimension_numbers = #tpu.dot_dimension_numbers<[1], [0], [0], [1], [0, 0, 1, 1], [], []>} : vector<128x128xbf16>, vector<128x128xbf16>, vector<128x128xf32> -> vector<128x128xf32>
    %39 = vector.broadcast %3 : vector<128x1xf32> to vector<128x128xf32>
    %40 = arith.mulf %38, %39 : vector<128x128xf32>
    %c0_22 = arith.constant 0 : index
    %c0_23 = arith.constant 0 : index
    %41 = vector.load %arg9[%c0_22, %c0_23] : memref<1x128xf32, #tpu.memory_space<vmem>>, vector<1x128xf32>
    %42 = vector.broadcast %41 : vector<1x128xf32> to vector<128x128xf32>
    %43 = arith.addf %40, %42 : vector<128x128xf32>
    %cst_24 = arith.constant 0.000000e+00 : f32
    %44 = vector.broadcast %cst_24 : f32 to vector<128x128xf32>
    %45 = arith.maximumf %43, %44 : vector<128x128xf32>
    %46 = arith.truncf %45 : vector<128x128xf32> to vector<128x128xbf16>
    %c0_25 = arith.constant 0 : index
    %c0_26 = arith.constant 0 : index
    %47 = vector.load %arg10[%c0_25, %c0_26] : memref<128x128xbf16, #tpu.memory_space<vmem>>, vector<128x128xbf16>
    tpu.vector_store %arg10[%c0_25, %c0_26], %46 {strides = array<i32>} : memref<128x128xbf16, #tpu.memory_space<vmem>>, vector<128x128xbf16>,
    return
  }
  func.func @transform_0(%arg0: i32) -> (i32, i32) {
    %c0_i32 = arith.constant 0 : i32
    %c0_i32_0 = arith.constant 0 : i32
    %c0_i32_1 = arith.constant 0 : i32
    return %c0_i32, %c0_i32_0 : i32, i32
  }
  func.func @transform_1(%arg0: i32) -> (i32, i32) {
    %c0_i32 = arith.constant 0 : i32
    %c0_i32_0 = arith.constant 0 : i32
    %c0_i32_1 = arith.constant 0 : i32
    return %c0_i32, %c0_i32_0 : i32, i32
  }
  func.func @transform_2(%arg0: i32) -> (i32, i32) {
    %c0_i32 = arith.constant 0 : i32
    %c0_i32_0 = arith.constant 0 : i32
    %c0_i32_1 = arith.constant 0 : i32
    return %c0_i32, %c0_i32_0 : i32, i32
  }
  func.func @transform_3(%arg0: i32) -> (i32, i32) {
    %c0_i32 = arith.constant 0 : i32
    %c0_i32_0 = arith.constant 0 : i32
    %c0_i32_1 = arith.constant 0 : i32
    return %c0_i32, %c0_i32_0 : i32, i32
  }
  func.func @transform_4(%arg0: i32) -> (i32, i32) {
    %c0_i32 = arith.constant 0 : i32
    %c0_i32_0 = arith.constant 0 : i32
    %c0_i32_1 = arith.constant 0 : i32
    return %c0_i32, %c0_i32_0 : i32, i32
  }
  func.func @transform_5(%arg0: i32) -> (i32, i32) {
    %c0_i32 = arith.constant 0 : i32
    %c0_i32_0 = arith.constant 0 : i32
    %c0_i32_1 = arith.constant 0 : i32
    return %c0_i32, %c0_i32_0 : i32, i32
  }
  func.func @transform_6(%arg0: i32) -> (i32, i32) {
    %c0_i32 = arith.constant 0 : i32
    %c0_i32_0 = arith.constant 0 : i32
    %c0_i32_1 = arith.constant 0 : i32
    return %c0_i32, %c0_i32_0 : i32, i32
  }
  func.func @transform_7(%arg0: i32) -> (i32, i32) {
    %c0_i32 = arith.constant 0 : i32
    %c0_i32_0 = arith.constant 0 : i32
    %c0_i32_1 = arith.constant 0 : i32
    return %c0_i32, %c0_i32_0 : i32, i32
  }
  func.func @transform_8(%arg0: i32) -> (i32, i32) {
    %c0_i32 = arith.constant 0 : i32
    %c0_i32_0 = arith.constant 0 : i32
    %c0_i32_1 = arith.constant 0 : i32
    return %c0_i32, %c0_i32_0 : i32, i32
  }
  func.func @transform_9(%arg0: i32) -> (i32, i32) {
    %c0_i32 = arith.constant 0 : i32
    %c0_i32_0 = arith.constant 0 : i32
    %c0_i32_1 = arith.constant 0 : i32
    return %c0_i32, %c0_i32_0 : i32, i32
  }
}

</mosaic_0001>

<bundles_post_ra>
// kernel: gca_forward.1
= control target key start
LH: loop header
LB: loop body
LE: loop exit
PB: predicated region body
PF: predicated region fallthrough
CT: control target
= control target key end

     0   :  { %v1753_v1 = vmov 0   ;;  %s2219_s3 = inlined_call_operand.vmem [shape: bf16[128,128], index: 3, kind: input, shape index: {}]   ;;  %s2220_s2 = inlined_call_operand.vmem [shape: bf16[128,128], index: 2, kind: input, shape index: {}]   ;;  %s2221_s1 = inlined_call_operand.vmem [shape: f32[128,1], index: 1, kind: input, shape index: {}]   ;;  %s2222_s0 = inlined_call_operand.vmem [shape: s8[128,128], index: 0, kind: input, shape index: {}]   ;;  %s2223_s5 = inlined_call_operand.vmem [shape: bf16[128,128], index: 5, kind: input, shape index: {}]   ;;  %s2224_s4 = inlined_call_operand.vmem [shape: f32[1,128], index: 4, kind: input, shape index: {}]   ;;  %s2225_s7 = inlined_call_operand.vmem [shape: bf16[128,128], index: 7, kind: input, shape index: {}]   ;;  %s2226_s6 = inlined_call_operand.vmem [shape: f32[1,128], index: 6, kind: input, shape index: {}]   ;;  %s2227_s8 = inlined_call_operand.vmem [shape: f32[1,128], index: 8, kind: input, shape index: {}]   ;;  %s2228_s9 = inlined_call_operand.vmem [shape: bf16[128,128], index: 9, kind: output, shape index: {}]  }
   0x1   :  { %v1721_v0 = vld [vmem:[%s2219_s3] sm:$0xff]   ;;  %1719 = vset.pattern.permute.xlu0 %v1753_v1  ;;  %1720 = vset.pattern.permute.xlu1 %v1753_v1  ;;  %v1722_v2 = vld [vmem:[%s2219_s3 + $0x8] sm:$0xff]   ;;  %v1723_v3 = vld [vmem:[%s2219_s3 + $0x10] sm:$0xff]  }
   0x2   :  { %1526 = vmatprep.subr.bf16.mxu0 %v1721_v0  ;;  %v1724_v4 = vld [vmem:[%s2219_s3 + $0x18] sm:$0xff]   ;;  %v1729_v5 = vld [vmem:[%s2220_s2] sm:$0xff]   ;;  %v1726_v7 = vld [vmem:[%s2219_s3 + $0x28] sm:$0xff]  }
   0x3   :  { %1527 = vmatpush3.bf16.msra.mxu0 %v1721_v0  ;;  %1542 = vmatprep.mubr.bf16.mxu0 %v1729_v5  ;;  %v1725_v6 = vld [vmem:[%s2219_s3 + $0x20] sm:$0xff]   ;;  %v47_v9 = vld [vmem:[%s2221_s1 + $0x10] sm:$0xff]  ;;  %v46_v10 = vld [vmem:[%s2221_s1 + $0x8] sm:$0xff] }
   0x4   :  { %1528 = vmatprep.subr.bf16.mxu0 %v1722_v2  ;;  %v45_v8 = vld [vmem:[%s2221_s1] sm:$0xff]  ;;  %298 = vperm.xlu1 %1720, %v47_v9   ;;  %v48_v11 = vld [vmem:[%s2221_s1 + $0x18] sm:$0xff]  ;;  %v1727_v12 = vld [vmem:[%s2219_s3 + $0x30] sm:$0xff]  }
   0x5   :  { %288 = vperm.xlu0 %1719, %v45_v8   ;;  %v49_v13 = vld [vmem:[%s2221_s1 + $0x20] sm:$0xff]  ;;  %v50_v14 = vld [vmem:[%s2221_s1 + $0x28] sm:$0xff]  ;;  %v1728_v15 = vld [vmem:[%s2219_s3 + $0x38] sm:$0xff]  }
   0x6   :  { %v51_v16 = vld [vmem:[%s2221_s1 + $0x30] sm:$0xff]  ;;  %v52_v17 = vld [vmem:[%s2221_s1 + $0x38] sm:$0xff]  ;;  %v1730_v18 = vld [vmem:[%s2220_s2 + $0x8] sm:$0xff]  }
   0x7   :  { %1529 = vmatpush3.bf16.msra.mxu0 %v1722_v2  ;;  %v53_v19 = vld [vmem:[%s2221_s1 + $0x40] sm:$0xff]  ;;  %v54_v20 = vld [vmem:[%s2221_s1 + $0x48] sm:$0xff]  ;;  %v1731_v21 = vld [vmem:[%s2220_s2 + $0x10] sm:$0xff]  }
   0x8   :  { %1530 = vmatprep.subr.bf16.mxu0 %v1723_v3  ;;  %303 = vperm.xlu1 %1720, %v48_v11   ;;  %v55_v22 = vld [vmem:[%s2221_s1 + $0x50] sm:$0xff]  ;;  %v56_v23 = vld [vmem:[%s2221_s1 + $0x58] sm:$0xff]  ;;  %v57_v25 = vld [vmem:[%s2221_s1 + $0x60] sm:$0xff] }
   0x9   :  { %293 = vperm.xlu0 %1719, %v46_v10   ;;  %v1732_v24 = vld [vmem:[%s2220_s2 + $0x18] sm:$0xff]   ;;  %v58_v26 = vld [vmem:[%s2221_s1 + $0x68] sm:$0xff]  ;;  %v1733_v27 = vld [vmem:[%s2220_s2 + $0x20] sm:$0xff]  }
   0xa   :  { %v59_v28 = vld [vmem:[%s2221_s1 + $0x70] sm:$0xff]  ;;  %v60_v29 = vld [vmem:[%s2221_s1 + $0x78] sm:$0xff]  ;;  %v1734_v30 = vld [vmem:[%s2220_s2 + $0x28] sm:$0xff]  }
   0xb   :  { %1531 = vmatpush3.bf16.msra.mxu0 %v1723_v3  ;;  %v1735_v31 = vld [vmem:[%s2220_s2 + $0x30] sm:$0xff]   ;;  %v1736_v32 = vld [vmem:[%s2220_s2 + $0x38] sm:$0xff]   ;;  %v1903_v33 = vld [vmem:[%s2222_s0] sm:$0xff] }
   0xc   :  { %1532 = vmatprep.subr.bf16.mxu0 %v1724_v4  ;;  %313 = vperm.xlu1 %1720, %v50_v14   ;;  %v1906_v34 = vunpack.c.l.s8.bf16 %v1903_v33  ;;  %v1737_v35 = vld [vmem:[%s2223_s5] sm:$0xff]   ;;  %v1738_v36 = vld [vmem:[%s2223_s5 + $0x8] sm:$0xff]   ;;  %v1739_v37 = vld [vmem:[%s2223_s5 + $0x10] sm:$0xff]  }
   0xd   :  { %308 = vperm.xlu0 %1719, %v49_v13   ;;  %v1740_v38 = vld [vmem:[%s2223_s5 + $0x18] sm:$0xff]   ;;  %v1741_v39 = vld [vmem:[%s2223_s5 + $0x20] sm:$0xff]  }
   0xe   :  { %1574 = vmatprep.mubr.bf16.mxu1 %v1906_v34 }
   0xf   :  { %1533 = vmatpush3.bf16.msra.mxu0 %v1724_v4 }
  0x10   :  { %1534 = vmatprep.subr.bf16.mxu0 %v1725_v6  ;;  %323 = vperm.xlu1 %1720, %v52_v17  }
  0x11   :  { %318 = vperm.xlu0 %1719, %v51_v16  }
  0x13   :  { %1535 = vmatpush3.bf16.msra.mxu0 %v1725_v6 }
  0x14   :  { %1536 = vmatprep.subr.bf16.mxu0 %v1726_v7  ;;  %333 = vperm.xlu1 %1720, %v54_v20  }
  0x15   :  { %328 = vperm.xlu0 %1719, %v53_v19  }
  0x17   :  { %1537 = vmatpush3.bf16.msra.mxu0 %v1726_v7 }
  0x18   :  { %1538 = vmatprep.subr.bf16.mxu0 %v1727_v12  ;;  %343 = vperm.xlu1 %1720, %v56_v23  }
  0x19   :  { %338 = vperm.xlu0 %1719, %v55_v22  }
  0x1b   :  { %1539 = vmatpush3.bf16.msra.mxu0 %v1727_v12 }
  0x1c   :  { %1540 = vmatprep.subr.bf16.mxu0 %v1728_v15  ;;  %353 = vperm.xlu1 %1720, %v58_v26  }
  0x1d   :  { %348 = vperm.xlu0 %1719, %v57_v25  }
  0x1f   :  { %1541 = vmatpush3.bf16.msra.mxu0 %v1728_v15 }
  0x20   :  { %363 = vperm.xlu1 %1720, %v60_v29   ;;  %1590 = vmatprep.subr.bf16.mxu0 %v1737_v35 }
  0x21   :  { %358 = vperm.xlu0 %1719, %v59_v28  }
  0x22   :  { %1543 = vmatmul.mubr.bf16.vlgmr.msra.gmra.mrb[0].mxu0 %v1730_v18 }
  0x23   :  { %1546 = vmatprep.mubr.bf16.mxu0 %v1731_v21  ;;  %1591 = vmatpush3.bf16.msra.mxu0 %v1737_v35  ;;  %v1976_v35 = vunpack.c.h.s8.bf16 %v1903_v33  ;;  %v36_v33 = vld [vmem:[%s2222_s0 + $0x18] sm:$0xff] }
  0x24   :  { %1592 = vmatprep.subr.bf16.mxu0 %v1738_v36 }
  0x27   :  { %1593 = vmatpush3.bf16.msra.mxu0 %v1738_v36 }
  0x28   :  { %1594 = vmatprep.subr.bf16.mxu0 %v1739_v37 }
  0x2a   :  { %1547 = vmatmul.mubr.bf16.gmra.mrb[4].mxu0 %v1732_v24 }
  0x2b   :  { %1550 = vmatprep.mubr.bf16.mxu0 %v1733_v27  ;;  %1595 = vmatpush3.bf16.msra.mxu0 %v1739_v37  ;;  %v35_v37 = vld [vmem:[%s2222_s0 + $0x10] sm:$0xff] }
  0x2c   :  { %1596 = vmatprep.subr.bf16.mxu0 %v1740_v38 }
  0x2f   :  { %1597 = vmatpush3.bf16.msra.mxu0 %v1740_v38 }
  0x30   :  { %1598 = vmatprep.subr.bf16.mxu0 %v1741_v39 }
  0x32   :  { %1551 = vmatmul.mubr.bf16.gmra.mrb[8].mxu0 %v1734_v30 }
  0x33   :  { %1554 = vmatprep.mubr.bf16.mxu0 %v1735_v31  ;;  %1599 = vmatpush3.bf16.msra.mxu0 %v1741_v39  ;;  %v1987_v39 = vunpack.c.l.s8.bf16 %v35_v37 }
  0x3a   :  { %1555 = vmatmul.mubr.bf16.gmra.mrb[12].mxu0 %v1736_v32  ;;  %v34_v32 = vld [vmem:[%s2222_s0 + $0x8] sm:$0xff] }
  0x3b   :  { %v1978_v36 = vunpack.c.l.s8.bf16 %v34_v32  ;;  %v1985_v38 = vunpack.c.h.s8.bf16 %v34_v32 }
  0x83   :  { %v1926_v41 = vpop.permute.xlu1 %298 }
  0x84   :  { %v1924_v40 = vpop.permute.xlu0 %288 }
  0x87   :  { %v1930_v43 = vpop.permute.xlu1 %303 }
  0x88   :  { %v1928_v42 = vpop.permute.xlu0 %293 }
  0x8b   :  { %v1934_v45 = vpop.permute.xlu1 %313 }
  0x8c   :  { %v1932_v44 = vpop.permute.xlu0 %308 }
  0x8f   :  { %v1938_v49 = vpop.permute.xlu1 %323 }
  0x90   :  { %v1936_v47 = vpop.permute.xlu0 %318 }
  0x93   :  { %v1946_v59 = vpop.permute.xlu1 %333 }
  0x94   :  { %v1944_v58 = vpop.permute.xlu0 %328 }
  0x97   :  { %v1954_v6 = vpop.permute.xlu1 %343 }
  0x98   :  { %v1952_v4 = vpop.permute.xlu0 %338 }
  0x9b   :  { %v1960_v15 = vpop.permute.xlu1 %353 }
  0x9c   :  { %v1956_v11 = vpop.permute.xlu0 %348 }
  0x9f   :  { %v1966_v23 = vpop.permute.xlu1 %363 }
  0xa0   :  { %v1964_v21 = vpop.permute.xlu0 %358 }
  0xf5   :  { %v1544_v46 = vpop.f32.mrb[0].mxu0 }
  0xf6   :  { %v223_v48 = vpop.f32.mrb[1].mxu0  ;;  %v368_v51 = vmul.f32 %v1544_v46, %v1926_v41  ;;  %v1994_v46 = vunpack.c.h.s8.bf16 %v35_v37 }
  0xf7   :  { %v1545_v50 = vpop.f32.mrb[2].mxu0  ;;  %v366_v54 = vmul.f32 %v1924_v40, %v223_v48  ;;  %v1996_v48 = vunpack.c.l.s8.bf16 %v36_v33 }
  0xf8   :  { %v369_v52 = vmul.f32 %v1545_v50, %v1930_v43  ;;  %v226_v53 = vpop.f32.mrb[3].mxu0  ;;  %v2000_v50 = vunpack.c.h.s8.bf16 %v36_v33 }
  0xf9   :  { %v367_v55 = vmul.f32 %v1928_v42, %v226_v53  ;;  %v1744_v53 = vld [vmem:[%s2223_s5 + $0x38] sm:$0xff]  }
  0xfa   :  { %v383_v56 = vpack.c.bf16 %v369_v52, %v368_v51  ;;  %v1742_v51 = vld [vmem:[%s2223_s5 + $0x28] sm:$0xff]   ;;  %v1743_v52 = vld [vmem:[%s2223_s5 + $0x30] sm:$0xff]  }
  0xfb   :  { %v382_v57 = vpack.c.bf16 %v367_v55, %v366_v54  ;;  %1600 = vmatprep.subr.bf16.mxu0 %v1742_v51  ;;  %v2016_v55 = vld [vmem:[%s2224_s4] ss:$0 sm:$0xff] }
  0xfc   :  { %1601 = vmatpush3.bf16.msra.mxu0 %v1742_v51 }
  0xfd   :  { %v1548_v60 = vpop.f32.mrb[4].mxu0  ;;  %1558 = vmatprep.subr.bf16.mxu1 %v382_v57  ;;  %1602 = vmatprep.subr.bf16.mxu0 %v1743_v52 }
  0xfe   :  { %v239_v61 = vpop.f32.mrb[5].mxu0  ;;  %1559 = vmatpush3.bf16.msra.mxu1 %v382_v57  ;;  %v372_v63 = vmul.f32 %v1548_v60, %v1936_v47 }
  0xff   :  { %v1549_v62 = vpop.f32.mrb[6].mxu0  ;;  %1560 = vmatprep.subr.bf16.mxu1 %v383_v56  ;;  %v370_v2 = vmul.f32 %v1932_v44, %v239_v61 }
 0x100   :  { %v373_v0 = vmul.f32 %v1549_v62, %v1938_v49  ;;  %v242_v1 = vpop.f32.mrb[7].mxu0  ;;  %1603 = vmatpush3.bf16.msra.mxu0 %v1743_v52 }
 0x101   :  { %v371_v3 = vmul.f32 %v1934_v45, %v242_v1  ;;  %1604 = vmatprep.subr.bf16.mxu0 %v1744_v53 }
 0x102   :  { %v385_v5 = vpack.c.bf16 %v373_v0, %v372_v63  ;;  %1561 = vmatpush3.bf16.msra.mxu1 %v383_v56 }
 0x103   :  { %v384_v7 = vpack.c.bf16 %v371_v3, %v370_v2 }
 0x104   :  { %1605 = vmatpush3.bf16.msra.mxu0 %v1744_v53 }
 0x105   :  { %v1552_v8 = vpop.f32.mrb[8].mxu0  ;;  %1562 = vmatprep.subr.bf16.mxu1 %v384_v7 }
 0x106   :  { %v255_v9 = vpop.f32.mrb[9].mxu0  ;;  %1563 = vmatpush3.bf16.msra.mxu1 %v384_v7  ;;  %v376_v12 = vmul.f32 %v1552_v8, %v1952_v4 }
 0x107   :  { %v1553_v10 = vpop.f32.mrb[10].mxu0  ;;  %1564 = vmatprep.subr.bf16.mxu1 %v385_v5  ;;  %v374_v16 = vmul.f32 %v1944_v58, %v255_v9 }
 0x108   :  { %v377_v13 = vmul.f32 %v1553_v10, %v1954_v6  ;;  %v258_v14 = vpop.f32.mrb[11].mxu0 }
 0x109   :  { %v375_v17 = vmul.f32 %v1946_v59, %v258_v14 }
 0x10a   :  { %v387_v18 = vpack.c.bf16 %v377_v13, %v376_v12  ;;  %1565 = vmatpush3.bf16.msra.mxu1 %v385_v5 }
 0x10b   :  { %v386_v19 = vpack.c.bf16 %v375_v17, %v374_v16 }
 0x10d   :  { %v1556_v20 = vpop.f32.mrb[12].mxu0  ;;  %1566 = vmatprep.subr.bf16.mxu1 %v386_v19 }
 0x10e   :  { %v271_v22 = vpop.f32.mrb[13].mxu0  ;;  %1567 = vmatpush3.bf16.msra.mxu1 %v386_v19  ;;  %v380_v25 = vmul.f32 %v1556_v20, %v1964_v21 }
 0x10f   :  { %v1557_v24 = vpop.f32.mrb[14].mxu0  ;;  %1568 = vmatprep.subr.bf16.mxu1 %v387_v18  ;;  %v378_v28 = vmul.f32 %v1956_v11, %v271_v22 }
 0x110   :  { %v381_v26 = vmul.f32 %v1557_v24, %v1966_v23  ;;  %v274_v27 = vpop.f32.mrb[15].mxu0 }
 0x111   :  { %v379_v29 = vmul.f32 %v1960_v15, %v274_v27 }
 0x112   :  { %v389_v30 = vpack.c.bf16 %v381_v26, %v380_v25  ;;  %1569 = vmatpush3.bf16.msra.mxu1 %v387_v18 }
 0x113   :  { %v388_v31 = vpack.c.bf16 %v379_v29, %v378_v28 }
 0x115   :  { %1570 = vmatprep.subr.bf16.mxu1 %v388_v31 }
 0x116   :  { %1571 = vmatpush3.bf16.msra.mxu1 %v388_v31 }
 0x117   :  { %1572 = vmatprep.subr.bf16.mxu1 %v389_v30 }
 0x11a   :  { %1573 = vmatpush3.bf16.msra.mxu1 %v389_v30 }
 0x11d   :  { %1575 = vmatmul.mubr.bf16.vlgmr.msra.gmra.mrb[0].mxu1 %v1976_v35 }
 0x11e   :  { %1578 = vmatprep.mubr.bf16.mxu1 %v1978_v36 }
 0x125   :  { %1579 = vmatmul.mubr.bf16.gmra.mrb[4].mxu1 %v1985_v38 }
 0x126   :  { %1582 = vmatprep.mubr.bf16.mxu1 %v1987_v39 }
 0x12d   :  { %1583 = vmatmul.mubr.bf16.gmra.mrb[8].mxu1 %v1994_v46 }
 0x12e   :  { %1586 = vmatprep.mubr.bf16.mxu1 %v1996_v48 }
 0x135   :  { %1587 = vmatmul.mubr.bf16.gmra.mrb[12].mxu1 %v2000_v50 }
 0x136   :  { %1638 = vmatprep.mubr.bf16.mxu1 %v1906_v34 }
 0x1f0   :  { %v1576_v54 = vpop.f32.mrb[0].mxu1 }
 0x1f1   :  { %v489_v56 = vmul.f32 %v1576_v54, %v1926_v41  ;;  %v424_v57 = vpop.f32.mrb[1].mxu1 }
 0x1f2   :  { %v487_v60 = vmul.f32 %v424_v57, %v1924_v40  ;;  %v1577_v61 = vpop.f32.mrb[2].mxu1 }
 0x1f3   :  { %v512_v62 = vadd.f32 %v2016_v55, %v489_v56  ;;  %v490_v63 = vmul.f32 %v1577_v61, %v1930_v43  ;;  %v427_v0 = vpop.f32.mrb[3].mxu1 }
 0x1f4   :  { %v510_v1 = vadd.f32 %v2016_v55, %v487_v60  ;;  %v488_v2 = vmul.f32 %v427_v0, %v1928_v42 }
 0x1f5   :  { %v513_v3 = vadd.f32 %v2016_v55, %v490_v63  ;;  %v528_v7 = vmax.f32 %v512_v62, 0.0 }
 0x1f6   :  { %v511_v5 = vadd.f32 %v2016_v55, %v488_v2  ;;  %v526_v9 = vmax.f32 %v510_v1, 0.0 }
 0x1f7   :  { %v529_v8 = vmax.f32 %v513_v3, 0.0 }
 0x1f8   :  { %v527_v10 = vmax.f32 %v511_v5, 0.0  ;;  %v1580_v12 = vpop.f32.mrb[4].mxu1 }
 0x1f9   :  { %v543_v13 = vpack.c.bf16 %v529_v8, %v528_v7  ;;  %v493_v14 = vmul.f32 %v1580_v12, %v1936_v47  ;;  %v440_v16 = vpop.f32.mrb[5].mxu1 }
 0x1fa   :  { %v491_v17 = vmul.f32 %v440_v16, %v1932_v44  ;;  %v1581_v18 = vpop.f32.mrb[6].mxu1  ;;  %v542_v19 = vpack.c.bf16 %v527_v10, %v526_v9 }
 0x1fb   :  { %v516_v20 = vadd.f32 %v2016_v55, %v493_v14  ;;  %v494_v22 = vmul.f32 %v1581_v18, %v1938_v49  ;;  %v443_v24 = vpop.f32.mrb[7].mxu1 }
 0x1fc   :  { %v514_v25 = vadd.f32 %v2016_v55, %v491_v17  ;;  %v492_v26 = vmul.f32 %v443_v24, %v1934_v45  ;;  %1606 = vmatprep.mubr.bf16.mxu0 %v542_v19 }
 0x1fd   :  { %v517_v27 = vadd.f32 %v2016_v55, %v494_v22  ;;  %1607 = vmatmul.mubr.bf16.vlgmr.msra.gmra.mrb[16].mxu0 %v543_v13  ;;  %v532_v29 = vmax.f32 %v516_v20, 0.0 }
 0x1fe   :  { %v515_v28 = vadd.f32 %v2016_v55, %v492_v26  ;;  %v530_v31 = vmax.f32 %v514_v25, 0.0 }
 0x1ff   :  { %v533_v30 = vmax.f32 %v517_v27, 0.0 }
 0x200   :  { %v531_v32 = vmax.f32 %v515_v28, 0.0  ;;  %v1584_v37 = vpop.f32.mrb[8].mxu1 }
 0x201   :  { %v497_v33 = vmul.f32 %v1584_v37, %v1952_v4  ;;  %v456_v51 = vpop.f32.mrb[9].mxu1  ;;  %v545_v52 = vpack.c.bf16 %v533_v30, %v532_v29  ;;  %v1746_v37 = vld [vmem:[%s2225_s7 + $0x8] sm:$0xff]  }
 0x202   :  { %v495_v53 = vmul.f32 %v456_v51, %v1944_v58  ;;  %v1585_v54 = vpop.f32.mrb[10].mxu1  ;;  %v544_v56 = vpack.c.bf16 %v531_v32, %v530_v31  ;;  %v1745_v32 = vld [vmem:[%s2225_s7] sm:$0xff]  }
 0x203   :  { %v520_v57 = vadd.f32 %v2016_v55, %v497_v33  ;;  %v498_v60 = vmul.f32 %v1585_v54, %v1954_v6  ;;  %v459_v61 = vpop.f32.mrb[11].mxu1  ;;  %1654 = vmatprep.subr.bf16.mxu0 %v1745_v32  ;;  %v1748_v33 = vld [vmem:[%s2225_s7 + $0x18] sm:$0xff]   ;;  %v1749_v51 = vld [vmem:[%s2225_s7 + $0x20] sm:$0xff]  }
 0x204   :  { %v518_v62 = vadd.f32 %v2016_v55, %v495_v53  ;;  %v496_v63 = vmul.f32 %v459_v61, %v1946_v59  ;;  %1610 = vmatprep.mubr.bf16.mxu0 %v544_v56  ;;  %1655 = vmatpush3.bf16.msra.mxu0 %v1745_v32 }
 0x205   :  { %v521_v0 = vadd.f32 %v2016_v55, %v498_v60  ;;  %1611 = vmatmul.mubr.bf16.gmra.mrb[20].mxu0 %v545_v52  ;;  %v536_v2 = vmax.f32 %v520_v57, 0.0  ;;  %1656 = vmatprep.subr.bf16.mxu0 %v1746_v37 }
 0x206   :  { %v519_v1 = vadd.f32 %v2016_v55, %v496_v63  ;;  %v534_v5 = vmax.f32 %v518_v62, 0.0 }
 0x207   :  { %v537_v3 = vmax.f32 %v521_v0, 0.0 }
 0x208   :  { %v535_v7 = vmax.f32 %v519_v1, 0.0  ;;  %v1588_v8 = vpop.f32.mrb[12].mxu1  ;;  %1657 = vmatpush3.bf16.msra.mxu0 %v1746_v37 }
 0x209   :  { %v501_v9 = vmul.f32 %v1588_v8, %v1964_v21  ;;  %v472_v10 = vpop.f32.mrb[13].mxu1  ;;  %v547_v12 = vpack.c.bf16 %v537_v3, %v536_v2 }
 0x20a   :  { %v499_v13 = vmul.f32 %v472_v10, %v1956_v11  ;;  %v1589_v14 = vpop.f32.mrb[14].mxu1  ;;  %v546_v16 = vpack.c.bf16 %v535_v7, %v534_v5 }
 0x20b   :  { %v524_v17 = vadd.f32 %v2016_v55, %v501_v9  ;;  %v502_v18 = vmul.f32 %v1589_v14, %v1966_v23  ;;  %v475_v19 = vpop.f32.mrb[15].mxu1 }
 0x20c   :  { %v522_v20 = vadd.f32 %v2016_v55, %v499_v13  ;;  %v500_v22 = vmul.f32 %v475_v19, %v1960_v15  ;;  %1614 = vmatprep.mubr.bf16.mxu0 %v546_v16 }
 0x20d   :  { %v525_v24 = vadd.f32 %v2016_v55, %v502_v18  ;;  %1615 = vmatmul.mubr.bf16.gmra.mrb[24].mxu0 %v547_v12  ;;  %v540_v26 = vmax.f32 %v524_v17, 0.0 }
 0x20e   :  { %v523_v25 = vadd.f32 %v2016_v55, %v500_v22  ;;  %v538_v28 = vmax.f32 %v522_v20, 0.0  ;;  %v1747_v55 = vld [vmem:[%s2225_s7 + $0x10] sm:$0xff]  }
 0x20f   :  { %v541_v27 = vmax.f32 %v525_v24, 0.0  ;;  %1658 = vmatprep.subr.bf16.mxu0 %v1747_v55 }
 0x210   :  { %v539_v29 = vmax.f32 %v523_v25, 0.0  ;;  %1659 = vmatpush3.bf16.msra.mxu0 %v1747_v55 }
 0x211   :  { %v549_v30 = vpack.c.bf16 %v541_v27, %v540_v26  ;;  %1660 = vmatprep.subr.bf16.mxu0 %v1748_v33 }
 0x212   :  { %v548_v31 = vpack.c.bf16 %v539_v29, %v538_v28 }
 0x214   :  { %1618 = vmatprep.mubr.bf16.mxu0 %v548_v31  ;;  %1661 = vmatpush3.bf16.msra.mxu0 %v1748_v33 }
 0x215   :  { %1619 = vmatmul.mubr.bf16.gmra.mrb[28].mxu0 %v549_v30  ;;  %1662 = vmatprep.subr.bf16.mxu0 %v1749_v51 }
 0x218   :  { %1663 = vmatpush3.bf16.msra.mxu0 %v1749_v51 }
 0x2d0   :  { %v1608_v52 = vpop.f32.mrb[16].mxu0 }
 0x2d1   :  { %v648_v53 = vpop.f32.mrb[17].mxu0  ;;  %v713_v56 = vmul.f32 %v1608_v52, %v1926_v41  ;;  %v1750_v52 = vld [vmem:[%s2225_s7 + $0x28] sm:$0xff]  }
 0x2d2   :  { %v1609_v54 = vpop.f32.mrb[18].mxu0  ;;  %v711_v61 = vmul.f32 %v648_v53, %v1924_v40  ;;  %1664 = vmatprep.subr.bf16.mxu0 %v1750_v52  ;;  %v1751_v53 = vld [vmem:[%s2225_s7 + $0x30] sm:$0xff]  }
 0x2d3   :  { %v714_v57 = vmul.f32 %v1609_v54, %v1930_v43  ;;  %v651_v60 = vpop.f32.mrb[19].mxu0  ;;  %1665 = vmatpush3.bf16.msra.mxu0 %v1750_v52  ;;  %v1752_v54 = vld [vmem:[%s2225_s7 + $0x38] sm:$0xff]  }
 0x2d4   :  { %v712_v62 = vmul.f32 %v651_v60, %v1928_v42  ;;  %1666 = vmatprep.subr.bf16.mxu0 %v1751_v53 }
 0x2d5   :  { %v728_v63 = vpack.c.bf16 %v714_v57, %v713_v56 }
 0x2d6   :  { %v727_v0 = vpack.c.bf16 %v712_v62, %v711_v61 }
 0x2d7   :  { %1667 = vmatpush3.bf16.msra.mxu0 %v1751_v53 }
 0x2d8   :  { %v1612_v1 = vpop.f32.mrb[20].mxu0  ;;  %1622 = vmatprep.subr.bf16.mxu1 %v727_v0  ;;  %1668 = vmatprep.subr.bf16.mxu0 %v1752_v54 }
 0x2d9   :  { %v664_v2 = vpop.f32.mrb[21].mxu0  ;;  %1623 = vmatpush3.bf16.msra.mxu1 %v727_v0  ;;  %v717_v5 = vmul.f32 %v1612_v1, %v1936_v47 }
 0x2da   :  { %v1613_v3 = vpop.f32.mrb[22].mxu0  ;;  %1624 = vmatprep.subr.bf16.mxu1 %v728_v63  ;;  %v715_v9 = vmul.f32 %v664_v2, %v1932_v44 }
 0x2db   :  { %v718_v7 = vmul.f32 %v1613_v3, %v1938_v49  ;;  %v667_v8 = vpop.f32.mrb[23].mxu0  ;;  %1669 = vmatpush3.bf16.msra.mxu0 %v1752_v54 }
 0x2dc   :  { %v716_v10 = vmul.f32 %v667_v8, %v1934_v45 }
 0x2dd   :  { %v730_v12 = vpack.c.bf16 %v718_v7, %v717_v5  ;;  %1625 = vmatpush3.bf16.msra.mxu1 %v728_v63 }
 0x2de   :  { %v729_v13 = vpack.c.bf16 %v716_v10, %v715_v9 }
 0x2e0   :  { %v1616_v14 = vpop.f32.mrb[24].mxu0  ;;  %1626 = vmatprep.subr.bf16.mxu1 %v729_v13 }
 0x2e1   :  { %v680_v16 = vpop.f32.mrb[25].mxu0  ;;  %1627 = vmatpush3.bf16.msra.mxu1 %v729_v13  ;;  %v721_v18 = vmul.f32 %v1616_v14, %v1952_v4 }
 0x2e2   :  { %v1617_v17 = vpop.f32.mrb[26].mxu0  ;;  %1628 = vmatprep.subr.bf16.mxu1 %v730_v12  ;;  %v719_v22 = vmul.f32 %v680_v16, %v1944_v58 }
 0x2e3   :  { %v722_v19 = vmul.f32 %v1617_v17, %v1954_v6  ;;  %v683_v20 = vpop.f32.mrb[27].mxu0 }
 0x2e4   :  { %v720_v24 = vmul.f32 %v683_v20, %v1946_v59 }
 0x2e5   :  { %v732_v25 = vpack.c.bf16 %v722_v19, %v721_v18  ;;  %1629 = vmatpush3.bf16.msra.mxu1 %v730_v12 }
 0x2e6   :  { %v731_v26 = vpack.c.bf16 %v720_v24, %v719_v22 }
 0x2e8   :  { %v1620_v27 = vpop.f32.mrb[28].mxu0  ;;  %1630 = vmatprep.subr.bf16.mxu1 %v731_v26 }
 0x2e9   :  { %v696_v28 = vpop.f32.mrb[29].mxu0  ;;  %1631 = vmatpush3.bf16.msra.mxu1 %v731_v26  ;;  %v725_v30 = vmul.f32 %v1620_v27, %v1964_v21 }
 0x2ea   :  { %v1621_v29 = vpop.f32.mrb[30].mxu0  ;;  %1632 = vmatprep.subr.bf16.mxu1 %v732_v25  ;;  %v723_v37 = vmul.f32 %v696_v28, %v1956_v11 }
 0x2eb   :  { %v726_v31 = vmul.f32 %v1621_v29, %v1966_v23  ;;  %v699_v32 = vpop.f32.mrb[31].mxu0 }
 0x2ec   :  { %v724_v55 = vmul.f32 %v699_v32, %v1960_v15 }
 0x2ed   :  { %v734_v33 = vpack.c.bf16 %v726_v31, %v725_v30  ;;  %1633 = vmatpush3.bf16.msra.mxu1 %v732_v25 }
 0x2ee   :  { %v733_v51 = vpack.c.bf16 %v724_v55, %v723_v37 }
 0x2f0   :  { %1634 = vmatprep.subr.bf16.mxu1 %v733_v51 }
 0x2f1   :  { %1635 = vmatpush3.bf16.msra.mxu1 %v733_v51 }
 0x2f2   :  { %1636 = vmatprep.subr.bf16.mxu1 %v734_v33 }
 0x2f5   :  { %1637 = vmatpush3.bf16.msra.mxu1 %v734_v33 }
 0x2f8   :  { %1639 = vmatmul.mubr.bf16.vlgmr.msra.gmra.mrb[16].mxu1 %v1976_v35 }
 0x2f9   :  { %1642 = vmatprep.mubr.bf16.mxu1 %v1978_v36 }
 0x300   :  { %1643 = vmatmul.mubr.bf16.gmra.mrb[20].mxu1 %v1985_v38 }
 0x301   :  { %1646 = vmatprep.mubr.bf16.mxu1 %v1987_v39 }
 0x308   :  { %1647 = vmatmul.mubr.bf16.gmra.mrb[24].mxu1 %v1994_v46 }
 0x309   :  { %1650 = vmatprep.mubr.bf16.mxu1 %v1996_v48 }
 0x310   :  { %1651 = vmatmul.mubr.bf16.gmra.mrb[28].mxu1 %v2000_v50 }
 0x311   :  { %1702 = vmatprep.mubr.bf16.mxu1 %v1906_v34  ;;  %v2101_v34 = vld [vmem:[%s2226_s6] ss:$0 sm:$0xff] }
 0x3cb   :  { %v1640_v56 = vpop.f32.mrb[16].mxu1 }
 0x3cc   :  { %v834_v57 = vmul.f32 %v1640_v56, %v1926_v41  ;;  %v769_v60 = vpop.f32.mrb[17].mxu1 }
 0x3cd   :  { %v832_v61 = vmul.f32 %v769_v60, %v1924_v40  ;;  %v1641_v62 = vpop.f32.mrb[18].mxu1 }
 0x3ce   :  { %v857_v63 = vadd.f32 %v2101_v34, %v834_v57  ;;  %v835_v0 = vmul.f32 %v1641_v62, %v1930_v43  ;;  %v772_v1 = vpop.f32.mrb[19].mxu1 }
 0x3cf   :  { %v855_v2 = vadd.f32 %v2101_v34, %v832_v61  ;;  %v833_v3 = vmul.f32 %v772_v1, %v1928_v42 }
 0x3d0   :  { %v858_v5 = vadd.f32 %v2101_v34, %v835_v0  ;;  %v873_v8 = vmax.f32 %v857_v63, 0.0 }
 0x3d1   :  { %v856_v7 = vadd.f32 %v2101_v34, %v833_v3  ;;  %v871_v10 = vmax.f32 %v855_v2, 0.0 }
 0x3d2   :  { %v874_v9 = vmax.f32 %v858_v5, 0.0 }
 0x3d3   :  { %v872_v12 = vmax.f32 %v856_v7, 0.0  ;;  %v1644_v13 = vpop.f32.mrb[20].mxu1 }
 0x3d4   :  { %v888_v14 = vpack.c.bf16 %v874_v9, %v873_v8  ;;  %v838_v16 = vmul.f32 %v1644_v13, %v1936_v47  ;;  %v785_v17 = vpop.f32.mrb[21].mxu1 }
 0x3d5   :  { %v836_v18 = vmul.f32 %v785_v17, %v1932_v44  ;;  %v1645_v19 = vpop.f32.mrb[22].mxu1  ;;  %v887_v20 = vpack.c.bf16 %v872_v12, %v871_v10 }
 0x3d6   :  { %v861_v22 = vadd.f32 %v2101_v34, %v838_v16  ;;  %v839_v24 = vmul.f32 %v1645_v19, %v1938_v49  ;;  %v788_v25 = vpop.f32.mrb[23].mxu1 }
 0x3d7   :  { %v859_v26 = vadd.f32 %v2101_v34, %v836_v18  ;;  %v837_v27 = vmul.f32 %v788_v25, %v1934_v45  ;;  %1670 = vmatprep.mubr.bf16.mxu0 %v887_v20 }
 0x3d8   :  { %v862_v28 = vadd.f32 %v2101_v34, %v839_v24  ;;  %1671 = vmatmul.mubr.bf16.vlgmr.msra.gmra.mrb[32].mxu0 %v888_v14  ;;  %v877_v30 = vmax.f32 %v861_v22, 0.0 }
 0x3d9   :  { %v860_v29 = vadd.f32 %v2101_v34, %v837_v27  ;;  %v875_v32 = vmax.f32 %v859_v26, 0.0 }
 0x3da   :  { %v878_v31 = vmax.f32 %v862_v28, 0.0 }
 0x3db   :  { %v876_v37 = vmax.f32 %v860_v29, 0.0  ;;  %v1648_v55 = vpop.f32.mrb[24].mxu1 }
 0x3dc   :  { %v842_v33 = vmul.f32 %v1648_v55, %v1952_v4  ;;  %v801_v51 = vpop.f32.mrb[25].mxu1  ;;  %v890_v52 = vpack.c.bf16 %v878_v31, %v877_v30 }
 0x3dd   :  { %v840_v53 = vmul.f32 %v801_v51, %v1944_v58  ;;  %v1649_v54 = vpop.f32.mrb[26].mxu1  ;;  %v889_v56 = vpack.c.bf16 %v876_v37, %v875_v32 }
 0x3de   :  { %v865_v57 = vadd.f32 %v2101_v34, %v842_v33  ;;  %v843_v60 = vmul.f32 %v1649_v54, %v1954_v6  ;;  %v804_v61 = vpop.f32.mrb[27].mxu1 }
 0x3df   :  { %v863_v62 = vadd.f32 %v2101_v34, %v840_v53  ;;  %v841_v63 = vmul.f32 %v804_v61, %v1946_v59  ;;  %1674 = vmatprep.mubr.bf16.mxu0 %v889_v56 }
 0x3e0   :  { %v866_v0 = vadd.f32 %v2101_v34, %v843_v60  ;;  %1675 = vmatmul.mubr.bf16.gmra.mrb[36].mxu0 %v890_v52  ;;  %v881_v2 = vmax.f32 %v865_v57, 0.0 }
 0x3e1   :  { %v864_v1 = vadd.f32 %v2101_v34, %v841_v63  ;;  %v879_v5 = vmax.f32 %v863_v62, 0.0 }
 0x3e2   :  { %v882_v3 = vmax.f32 %v866_v0, 0.0 }
 0x3e3   :  { %v880_v7 = vmax.f32 %v864_v1, 0.0  ;;  %v1652_v8 = vpop.f32.mrb[28].mxu1 }
 0x3e4   :  { %v846_v9 = vmul.f32 %v1652_v8, %v1964_v21  ;;  %v817_v10 = vpop.f32.mrb[29].mxu1  ;;  %v892_v12 = vpack.c.bf16 %v882_v3, %v881_v2 }
 0x3e5   :  { %v844_v13 = vmul.f32 %v817_v10, %v1956_v11  ;;  %v1653_v14 = vpop.f32.mrb[30].mxu1  ;;  %v891_v16 = vpack.c.bf16 %v880_v7, %v879_v5 }
 0x3e6   :  { %v869_v17 = vadd.f32 %v2101_v34, %v846_v9  ;;  %v847_v18 = vmul.f32 %v1653_v14, %v1966_v23  ;;  %v820_v19 = vpop.f32.mrb[31].mxu1 }
 0x3e7   :  { %v867_v20 = vadd.f32 %v2101_v34, %v844_v13  ;;  %v845_v22 = vmul.f32 %v820_v19, %v1960_v15  ;;  %1678 = vmatprep.mubr.bf16.mxu0 %v891_v16 }
 0x3e8   :  { %v870_v24 = vadd.f32 %v2101_v34, %v847_v18  ;;  %1679 = vmatmul.mubr.bf16.gmra.mrb[40].mxu0 %v892_v12  ;;  %v885_v26 = vmax.f32 %v869_v17, 0.0 }
 0x3e9   :  { %v868_v25 = vadd.f32 %v2101_v34, %v845_v22  ;;  %v883_v28 = vmax.f32 %v867_v20, 0.0 }
 0x3ea   :  { %v886_v27 = vmax.f32 %v870_v24, 0.0 }
 0x3eb   :  { %v884_v29 = vmax.f32 %v868_v25, 0.0 }
 0x3ec   :  { %v894_v30 = vpack.c.bf16 %v886_v27, %v885_v26 }
 0x3ed   :  { %v893_v31 = vpack.c.bf16 %v884_v29, %v883_v28 }
 0x3ef   :  { %1682 = vmatprep.mubr.bf16.mxu0 %v893_v31 }
 0x3f0   :  { %1683 = vmatmul.mubr.bf16.gmra.mrb[44].mxu0 %v894_v30 }
 0x4ab   :  { %v1672_v32 = vpop.f32.mrb[32].mxu0 }
 0x4ac   :  { %v993_v37 = vpop.f32.mrb[33].mxu0  ;;  %v1058_v33 = vmul.f32 %v1672_v32, %v1926_v41  ;;  %v2161_v32 = vld [vmem:[%s2227_s8] ss:$0 sm:$0xff] }
 0x4ad   :  { %v1673_v55 = vpop.f32.mrb[34].mxu0  ;;  %v1056_v53 = vmul.f32 %v993_v37, %v1924_v40 }
 0x4ae   :  { %v1059_v51 = vmul.f32 %v1673_v55, %v1930_v43  ;;  %v996_v52 = vpop.f32.mrb[35].mxu0 }
 0x4af   :  { %v1057_v34 = vmul.f32 %v996_v52, %v1928_v42 }
 0x4b0   :  { %v1073_v54 = vpack.c.bf16 %v1059_v51, %v1058_v33 }
 0x4b1   :  { %v1072_v56 = vpack.c.bf16 %v1057_v34, %v1056_v53 }
 0x4b3   :  { %v1676_v57 = vpop.f32.mrb[36].mxu0  ;;  %1686 = vmatprep.subr.bf16.mxu1 %v1072_v56 }
 0x4b4   :  { %v1009_v60 = vpop.f32.mrb[37].mxu0  ;;  %1687 = vmatpush3.bf16.msra.mxu1 %v1072_v56  ;;  %v1062_v62 = vmul.f32 %v1676_v57, %v1936_v47 }
 0x4b5   :  { %v1677_v61 = vpop.f32.mrb[38].mxu0  ;;  %1688 = vmatprep.subr.bf16.mxu1 %v1073_v54  ;;  %v1060_v1 = vmul.f32 %v1009_v60, %v1932_v44 }
 0x4b6   :  { %v1063_v63 = vmul.f32 %v1677_v61, %v1938_v49  ;;  %v1012_v0 = vpop.f32.mrb[39].mxu0 }
 0x4b7   :  { %v1061_v2 = vmul.f32 %v1012_v0, %v1934_v45 }
 0x4b8   :  { %v1075_v3 = vpack.c.bf16 %v1063_v63, %v1062_v62  ;;  %1689 = vmatpush3.bf16.msra.mxu1 %v1073_v54 }
 0x4b9   :  { %v1074_v5 = vpack.c.bf16 %v1061_v2, %v1060_v1 }
 0x4bb   :  { %v1680_v7 = vpop.f32.mrb[40].mxu0  ;;  %1690 = vmatprep.subr.bf16.mxu1 %v1074_v5 }
 0x4bc   :  { %v1025_v8 = vpop.f32.mrb[41].mxu0  ;;  %1691 = vmatpush3.bf16.msra.mxu1 %v1074_v5  ;;  %v1066_v10 = vmul.f32 %v1680_v7, %v1952_v4 }
 0x4bd   :  { %v1681_v9 = vpop.f32.mrb[42].mxu0  ;;  %1692 = vmatprep.subr.bf16.mxu1 %v1075_v3  ;;  %v1064_v14 = vmul.f32 %v1025_v8, %v1944_v58 }
 0x4be   :  { %v1067_v12 = vmul.f32 %v1681_v9, %v1954_v6  ;;  %v1028_v13 = vpop.f32.mrb[43].mxu0 }
 0x4bf   :  { %v1065_v16 = vmul.f32 %v1028_v13, %v1946_v59 }
 0x4c0   :  { %v1077_v17 = vpack.c.bf16 %v1067_v12, %v1066_v10  ;;  %1693 = vmatpush3.bf16.msra.mxu1 %v1075_v3 }
 0x4c1   :  { %v1076_v18 = vpack.c.bf16 %v1065_v16, %v1064_v14 }
 0x4c3   :  { %v1684_v19 = vpop.f32.mrb[44].mxu0  ;;  %1694 = vmatprep.subr.bf16.mxu1 %v1076_v18 }
 0x4c4   :  { %v1041_v20 = vpop.f32.mrb[45].mxu0  ;;  %1695 = vmatpush3.bf16.msra.mxu1 %v1076_v18  ;;  %v1070_v24 = vmul.f32 %v1684_v19, %v1964_v21 }
 0x4c5   :  { %v1685_v22 = vpop.f32.mrb[46].mxu0  ;;  %1696 = vmatprep.subr.bf16.mxu1 %v1077_v17  ;;  %v1068_v27 = vmul.f32 %v1041_v20, %v1956_v11 }
 0x4c6   :  { %v1071_v25 = vmul.f32 %v1685_v22, %v1966_v23  ;;  %v1044_v26 = vpop.f32.mrb[47].mxu0 }
 0x4c7   :  { %v1069_v28 = vmul.f32 %v1044_v26, %v1960_v15 }
 0x4c8   :  { %v1079_v29 = vpack.c.bf16 %v1071_v25, %v1070_v24  ;;  %1697 = vmatpush3.bf16.msra.mxu1 %v1077_v17 }
 0x4c9   :  { %v1078_v30 = vpack.c.bf16 %v1069_v28, %v1068_v27 }
 0x4cb   :  { %1698 = vmatprep.subr.bf16.mxu1 %v1078_v30 }
 0x4cc   :  { %1699 = vmatpush3.bf16.msra.mxu1 %v1078_v30 }
 0x4cd   :  { %1700 = vmatprep.subr.bf16.mxu1 %v1079_v29 }
 0x4d0   :  { %1701 = vmatpush3.bf16.msra.mxu1 %v1079_v29 }
 0x4d3   :  { %1703 = vmatmul.mubr.bf16.vlgmr.msra.gmra.mrb[32].mxu1 %v1976_v35 }
 0x4d4   :  { %1706 = vmatprep.mubr.bf16.mxu1 %v1978_v36 }
 0x4db   :  { %1707 = vmatmul.mubr.bf16.gmra.mrb[36].mxu1 %v1985_v38 }
 0x4dc   :  { %1710 = vmatprep.mubr.bf16.mxu1 %v1987_v39 }
 0x4e3   :  { %1711 = vmatmul.mubr.bf16.gmra.mrb[40].mxu1 %v1994_v46 }
 0x4e4   :  { %1714 = vmatprep.mubr.bf16.mxu1 %v1996_v48 }
 0x4eb   :  { %1715 = vmatmul.mubr.bf16.gmra.mrb[44].mxu1 %v2000_v50 }
 0x5a6   :  { %v1704_v31 = vpop.f32.mrb[32].mxu1 }
 0x5a7   :  { %v1179_v35 = vmul.f32 %v1704_v31, %v1926_v41  ;;  %v1114_v37 = vpop.f32.mrb[33].mxu1 }
 0x5a8   :  { %v1177_v36 = vmul.f32 %v1114_v37, %v1924_v40  ;;  %v1705_v38 = vpop.f32.mrb[34].mxu1 }
 0x5a9   :  { %v1202_v39 = vadd.f32 %v2161_v32, %v1179_v35  ;;  %v1180_v46 = vmul.f32 %v1705_v38, %v1930_v43  ;;  %v1117_v55 = vpop.f32.mrb[35].mxu1 }
 0x5aa   :  { %v1200_v48 = vadd.f32 %v2161_v32, %v1177_v36  ;;  %v1178_v50 = vmul.f32 %v1117_v55, %v1928_v42 }
 0x5ab   :  { %v1203_v33 = vadd.f32 %v2161_v32, %v1180_v46  ;;  %v1218_v52 = vmax.f32 %v1202_v39, 0.0 }
 0x5ac   :  { %v1201_v51 = vadd.f32 %v2161_v32, %v1178_v50  ;;  %v1216_v41 = vmax.f32 %v1200_v48, 0.0 }
 0x5ad   :  { %v1219_v53 = vmax.f32 %v1203_v33, 0.0 }
 0x5ae   :  { %v1217_v34 = vmax.f32 %v1201_v51, 0.0  ;;  %v1708_v54 = vpop.f32.mrb[36].mxu1 }
 0x5af   :  { %v1391_v40 = vpack.c.bf16 %v1219_v53, %v1218_v52  ;;  %v1183_v56 = vmul.f32 %v1708_v54, %v1936_v47  ;;  %v1130_v57 = vpop.f32.mrb[37].mxu1 }
 0x5b0   :  { %v1386_v60 = vpack.c.bf16 %v1217_v34, %v1216_v41  ;;  %v1181_v43 = vmul.f32 %v1130_v57, %v1932_v44  ;;  %v1709_v61 = vpop.f32.mrb[38].mxu1 }
 0x5b1   :  { %1423 = vst [vmem:[%s2228_s9 + $0x8] sm:$0xff] %v1391_v40   ;;  %v1206_v42 = vadd.f32 %v2161_v32, %v1183_v56  ;;  %v1184_v62 = vmul.f32 %v1709_v61, %v1938_v49  ;;  %v1133_v63 = vpop.f32.mrb[39].mxu1 }
 0x5b2   :  { %1387 = vst [vmem:[%s2228_s9] sm:$0xff] %v1386_v60   ;;  %v1204_v47 = vadd.f32 %v2161_v32, %v1181_v43  ;;  %v1182_v0 = vmul.f32 %v1133_v63, %v1934_v45 }
 0x5b3   :  { %v1207_v44 = vadd.f32 %v2161_v32, %v1184_v62  ;;  %v1222_v2 = vmax.f32 %v1206_v42, 0.0 }
 0x5b4   :  { %v1205_v1 = vadd.f32 %v2161_v32, %v1182_v0  ;;  %v1220_v5 = vmax.f32 %v1204_v47, 0.0 }
 0x5b5   :  { %v1223_v3 = vmax.f32 %v1207_v44, 0.0 }
 0x5b6   :  { %v1221_v7 = vmax.f32 %v1205_v1, 0.0  ;;  %v1712_v8 = vpop.f32.mrb[40].mxu1 }
 0x5b7   :  { %v1401_v9 = vpack.c.bf16 %v1223_v3, %v1222_v2  ;;  %v1187_v49 = vmul.f32 %v1712_v8, %v1952_v4  ;;  %v1146_v10 = vpop.f32.mrb[41].mxu1 }
 0x5b8   :  { %v1396_v12 = vpack.c.bf16 %v1221_v7, %v1220_v5  ;;  %v1185_v13 = vmul.f32 %v1146_v10, %v1944_v58  ;;  %v1713_v14 = vpop.f32.mrb[42].mxu1 }
 0x5b9   :  { %1425 = vst [vmem:[%s2228_s9 + $0x18] sm:$0xff] %v1401_v9   ;;  %v1210_v45 = vadd.f32 %v2161_v32, %v1187_v49  ;;  %v1188_v16 = vmul.f32 %v1713_v14, %v1954_v6  ;;  %v1149_v17 = vpop.f32.mrb[43].mxu1 }
 0x5ba   :  { %1424 = vst [vmem:[%s2228_s9 + $0x10] sm:$0xff] %v1396_v12   ;;  %v1208_v4 = vadd.f32 %v2161_v32, %v1185_v13  ;;  %v1186_v18 = vmul.f32 %v1149_v17, %v1946_v59 }
 0x5bb   :  { %v1211_v58 = vadd.f32 %v2161_v32, %v1188_v16  ;;  %v1226_v20 = vmax.f32 %v1210_v45, 0.0 }
 0x5bc   :  { %v1209_v19 = vadd.f32 %v2161_v32, %v1186_v18  ;;  %v1224_v24 = vmax.f32 %v1208_v4, 0.0 }
 0x5bd   :  { %v1227_v22 = vmax.f32 %v1211_v58, 0.0 }
 0x5be   :  { %v1225_v25 = vmax.f32 %v1209_v19, 0.0  ;;  %v1716_v26 = vpop.f32.mrb[44].mxu1 }
 0x5bf   :  { %v1411_v27 = vpack.c.bf16 %v1227_v22, %v1226_v20  ;;  %v1191_v6 = vmul.f32 %v1716_v26, %v1964_v21  ;;  %v1162_v28 = vpop.f32.mrb[45].mxu1 }
 0x5c0   :  { %v1406_v29 = vpack.c.bf16 %v1225_v25, %v1224_v24  ;;  %v1189_v30 = vmul.f32 %v1162_v28, %v1956_v11  ;;  %v1717_v31 = vpop.f32.mrb[46].mxu1 }
 0x5c1   :  { %1427 = vst [vmem:[%s2228_s9 + $0x28] sm:$0xff] %v1411_v27   ;;  %v1214_v59 = vadd.f32 %v2161_v32, %v1191_v6  ;;  %v1192_v35 = vmul.f32 %v1717_v31, %v1966_v23  ;;  %v1165_v37 = vpop.f32.mrb[47].mxu1 }
 0x5c2   :  { %1426 = vst [vmem:[%s2228_s9 + $0x20] sm:$0xff] %v1406_v29   ;;  %v1212_v21 = vadd.f32 %v2161_v32, %v1189_v30  ;;  %v1190_v36 = vmul.f32 %v1165_v37, %v1960_v15 }
 0x5c3   :  { %v1215_v11 = vadd.f32 %v2161_v32, %v1192_v35  ;;  %v1230_v39 = vmax.f32 %v1214_v59, 0.0 }
 0x5c4   :  { %v1213_v38 = vadd.f32 %v2161_v32, %v1190_v36  ;;  %v1228_v55 = vmax.f32 %v1212_v21, 0.0 }
 0x5c5   :  { %v1231_v46 = vmax.f32 %v1215_v11, 0.0 }
 0x5c6   :  { %v1229_v48 = vmax.f32 %v1213_v38, 0.0 }
 0x5c7   :  { %v1421_v50 = vpack.c.bf16 %v1231_v46, %v1230_v39 }
 0x5c8   :  { %v1416_v33 = vpack.c.bf16 %v1229_v48, %v1228_v55 }
 0x5c9   :  { %1429 = vst [vmem:[%s2228_s9 + $0x38] sm:$0xff] %v1421_v50  }
 0x5ca   :  { %1428 = vst [vmem:[%s2228_s9 + $0x30] sm:$0xff] %v1416_v33  }

</bundles_post_ra>
